<compile_context>
chip_gen: v7x
topology: tpu7x:2x2x1
jax: 0.10.0
libtpu: 0.0.40
codegen_flags: <defaults>
</compile_context>

<pallas_src>
import functools

import jax
import jax.numpy as jnp
from jax import lax
from jax.experimental import pallas as pl
from jax.experimental.pallas import tpu as pltpu


# --------------------------------------------------------------------------------------
# Kernel
# --------------------------------------------------------------------------------------
def _attention_kernel(enc_ref, dec_ref,
                      w_enc_ref, b_enc_ref,
                      w_dec_ref, b_dec_ref,
                      w_full_ref,
                      awe_ref, alpha_ref,
                      *, n_valid):
    """One batch block.

    enc_ref   : (B_blk, N_pad, E)  encoder_out block (pixel axis zero-padded)
    dec_ref   : (B_blk, D)
    w_enc_ref : (E, A), b_enc_ref: (1, A)
    w_dec_ref : (D, A), b_dec_ref: (1, A)
    w_full_ref: (1, A)             (PyTorch layout of Linear(A, 1).weight)
    awe_ref   : (B_blk, E)
    alpha_ref : (B_blk, N_pad)     lane-dense softmax output
    """
    enc = enc_ref[...]                                  # (bb, Np, E), input dtype
    dec = dec_ref[...]                                  # (bb, D)
    bb, npad, e = enc.shape

    # att1 = encoder_out @ W_enc + b_enc on the MXU: bf16 operands, f32 accumulate.
    # N_pad is a multiple of 8, so the flatten below is a free relayout.
    att1 = jnp.dot(enc.astype(jnp.bfloat16).reshape(bb * npad, e),
                   w_enc_ref[...].astype(jnp.bfloat16),
                   preferred_element_type=jnp.float32) + b_enc_ref[...]      # (bb*Np, A)
    a_dim = att1.shape[-1]
    att1 = att1.reshape(bb, npad, a_dim)                                     # (bb, Np, A)

    # att2 = decoder_hidden @ W_dec + b_dec (tiny matmul; f32 accumulate).
    att2 = jnp.dot(dec, w_dec_ref[...],
                   preferred_element_type=jnp.float32) + b_dec_ref[...]      # (bb, A)

    h = jnp.maximum(att1 + att2[:, None, :], 0.0)                            # (bb, Np, A)

    # scores = full_att(h): width-1 projection on the VPU (mul) + XLU (lane reduce).
    # b_full is intentionally omitted: it cancels in the softmax.
    # TODO(synk): if a bundle dump shows the XLU slot saturated at production sizes,
    # move this onto the MXU as a (bb*Np, A) x (A, 128) matmul whose column 0 is w_full.
    scores = jnp.sum(h * w_full_ref[...], axis=-1)                           # (bb, Np)

    # Mask the zero-padded pixel positions so they receive zero attention weight.
    if npad != n_valid:
        col = lax.broadcasted_iota(jnp.int32, (bb, npad), 1)
        scores = jnp.where(col < n_valid, scores, -1e30)

    # Softmax over the pixel axis (lane axis), max-stabilized, exact denominator.
    m = jnp.max(scores, axis=-1, keepdims=True)                              # (bb, 1)
    ex = jnp.exp(scores - m)                                                 # (bb, Np)
    denom = jnp.sum(ex, axis=-1, keepdims=True)                              # (bb, 1)
    alpha = ex * (1.0 / denom)                                               # (bb, Np)

    # Attention-weighted encoding: VPU multiply + XLU sublane reduce over N, in f32.
    # (Replaces the previous per-batch M=1 MXU matmuls.)
    awe = jnp.sum(enc.astype(jnp.float32) * alpha[:, :, None], axis=1)       # (bb, E)

    awe_ref[...] = awe.astype(awe_ref.dtype)
    alpha_ref[...] = alpha.astype(alpha_ref.dtype)


# --------------------------------------------------------------------------------------
# Generation-aware sizing
# --------------------------------------------------------------------------------------
# (per-block live-bytes cap used to pick B_blk, vmem_limit_bytes cap).
# v5e / v6e have 128 MiB physical VMEM; v7x only 64 MiB, so it gets a tighter budget.
_GEN_BUDGETS = {
    "v5e": (14 << 20, 88 << 20),
    "v6e": (14 << 20, 88 << 20),
    "v7x": (8 << 20, 48 << 20),
}
_DEFAULT_BUDGET = (8 << 20, 48 << 20)   # unknown chip: assume the tightest (v7x-like)


def _tpu_generation():
    try:
        kind = jax.devices()[0].device_kind.lower()
    except Exception:
        return "unknown"
    if "v5e" in kind or "v5 lite" in kind or "v5litepod" in kind:
        return "v5e"
    if "v6" in kind:
        return "v6e"
    if "v7" in kind or "7x" in kind:
        return "v7x"
    return "unknown"


def _block_live_bytes(bb, n_pad, e, d, a, in_itemsize):
    """Conservative per-grid-step VMEM live-set estimate, including the f32 att1/relu
    intermediates and the awe product (previously omitted from the budget)."""
    f32 = 4
    enc_in   = bb * n_pad * e * in_itemsize   # encoder slab in input dtype
    enc_bf16 = bb * n_pad * e * 2             # bf16 copy fed to the MXU
    att1_h   = 2 * bb * n_pad * a * f32       # att1 + relu(h) f32 intermediates
    awe_prod = bb * n_pad * e * f32           # enc * alpha product before the N-reduce
    rows     = 4 * bb * n_pad * f32           # scores / exp / alpha / mask temporaries
    small    = bb * (d + e + a) * f32         # decoder block, awe block, att2
    return enc_in + enc_bf16 + att1_h + awe_prod + rows + small


def _pick_batch_block(B, n_pad, e, d, a, in_itemsize, generation):
    """Largest batch block (divisor of B) whose live set fits the per-generation cap.
    Prefers B_blk % 8 == 0 and (B_blk * n_pad) % 256 == 0 so MXU passes and the
    (B_blk, E)/(B_blk, N_pad) output tiles stay sublane-aligned (unmasked stores)."""
    blk_cap, _ = _GEN_BUDGETS.get(generation, _DEFAULT_BUDGET)

    def fits(bb):
        return _block_live_bytes(bb, n_pad, e, d, a, in_itemsize) <= blk_cap

    if fits(B):
        return B
    divisors = [x for x in range(1, B) if B % x == 0 and fits(x)]
    if not divisors:
        return 1
    for pred in (lambda x: x % 8 == 0 and (x * n_pad) % 256 == 0,
                 lambda x: x % 8 == 0,
                 lambda x: True):
        cand = [x for x in divisors if pred(x)]
        if cand:
            return max(cand)
    return 1


def _vmem_limit_bytes(bb, n_pad, e, d, a, in_itemsize, generation):
    """Explicit VMEM budget: double-buffered per-step I/O blocks + single-buffered
    resident weights + in-kernel intermediates, with 25% headroom for Mosaic internal
    scratch, clamped only to a per-generation cap (no blanket 32 MiB clamp)."""
    _, vmem_cap = _GEN_BUDGETS.get(generation, _DEFAULT_BUDGET)
    f32 = 4
    io = 2 * (bb * n_pad * e * in_itemsize      # encoder_out block
              + bb * d * in_itemsize            # decoder_hidden block
              + bb * e * in_itemsize            # awe block
              + bb * n_pad * in_itemsize)       # alpha block
    weights = (e * a + a + d * a + a + a) * f32  # single-buffered residents
    live = _block_live_bytes(bb, n_pad, e, d, a, in_itemsize)
    budget = int(1.25 * (io + weights + live))
    return max(min(budget, vmem_cap), 8 << 20)


def _resident_spec(shape):
    """BlockSpec for an operand fetched once and kept resident across grid steps:
    constant index map and single-buffered (default double buffering would waste VMEM
    on a second copy of a weight that never changes)."""
    zeros = (0,) * len(shape)
    try:
        return pl.BlockSpec(shape, lambda b: zeros, pipeline_mode=pl.Buffered(1))
    except Exception:  # jax version without pipeline_mode / Buffered
        return pl.BlockSpec(shape, lambda b: zeros)


# --------------------------------------------------------------------------------------
# Wrapper
# --------------------------------------------------------------------------------------
def attention_forward(encoder_out, decoder_hidden, params, *, batch_block=None):
    """Forward pass of the additive attention module.

    params: w_enc (E,A), b_enc (1,A), w_dec (D,A), b_dec (1,A), w_full (1,A).
    (b_full may be present in params but is not used: it cancels in the softmax.)
    Returns (attention_weighted_encoding (B, E), alpha (B, N)).
    """
    B, N, E = encoder_out.shape
    _, D = decoder_hidden.shape
    A = params["w_enc"].shape[1]
    dtype = encoder_out.dtype
    in_itemsize = jnp.dtype(dtype).itemsize

    # Pad the pixel axis to a lane multiple so that (a) the in-kernel flatten reshape is
    # a free relayout and (b) alpha stores are unmasked full-lane stores.  Padded rows
    # are zero-filled and masked to -inf before the softmax; alpha is sliced back below.
    LANE = 128
    N_pad = ((N + LANE - 1) // LANE) * LANE
    enc_padded = (encoder_out if N_pad == N
                  else jnp.pad(encoder_out, ((0, 0), (0, N_pad - N), (0, 0))))

    gen = _tpu_generation()
    B_blk = batch_block or _pick_batch_block(B, N_pad, E, D, A, in_itemsize, gen)
    assert B % B_blk == 0, "batch block must divide the batch"
    grid = (B // B_blk,)
    vmem_limit = _vmem_limit_bytes(B_blk, N_pad, E, D, A, in_itemsize, gen)

    kernel = functools.partial(_attention_kernel, n_valid=N)

    awe, alpha_padded = pl.pallas_call(
        kernel,
        out_shape=(
            jax.ShapeDtypeStruct((B, E), dtype),
            jax.ShapeDtypeStruct((B, N_pad), dtype),
        ),
        grid_spec=pltpu.PrefetchScalarGridSpec(
            num_scalar_prefetch=0,
            grid=grid,
            in_specs=[
                # Per-step batch blocks (double-buffered by default).
                # TODO(synk): on v6e, if xprof shows exposed encoder DMA at production
                # sizes, deepen this spec to pipeline_mode=pl.Buffered(3).
                pl.BlockSpec((B_blk, N_pad, E), lambda b: (b, 0, 0)),
                pl.BlockSpec((B_blk, D), lambda b: (b, 0)),
                # Weights: constant index maps -> fetched once, single-buffered.
                _resident_spec((E, A)),    # w_enc
                _resident_spec((1, A)),    # b_enc
                _resident_spec((D, A)),    # w_dec
                _resident_spec((1, A)),    # b_dec
                _resident_spec((1, A)),    # w_full (row vector)
            ],
            out_specs=[
                pl.BlockSpec((B_blk, E), lambda b: (b, 0)),       # awe
                pl.BlockSpec((B_blk, N_pad), lambda b: (b, 0)),   # alpha (lane-dense)
            ],
        ),
        compiler_params=pltpu.CompilerParams(
            # Batch blocks are fully independent.
            # TODO(synk): on v7x, verify both TensorCores pick up blocks; if one TC does
            # all of them, switch to dimension_semantics=(pltpu.CORE_PARALLEL,).
            dimension_semantics=("parallel",),
            vmem_limit_bytes=vmem_limit),
    )(enc_padded, decoder_hidden,
      params["w_enc"], params["b_enc"],
      params["w_dec"], params["b_dec"],
      params["w_full"])

    alpha = alpha_padded if N_pad == N else alpha_padded[:, :N]
    return awe, alpha


# --------------------------------------------------------------------------------------
# Params / reference / test
# --------------------------------------------------------------------------------------
def init_params(key, encoder_dim, decoder_dim, attention_dim, dtype=jnp.float32):
    """Deterministic init mimicking nn.Linear (uniform +-1/sqrt(fan_in)).
    Weights are stored transposed ((in, out)); full_att weight as the (1, A) row vector.
    b_full is kept for parameterization fidelity but the kernel ignores it (it cancels
    in the softmax and never affects the module outputs)."""
    ks = jax.random.split(key, 6)

    def lin(kw, kb, fan_in, shape_w, shape_b):
        bound = 1.0 / jnp.sqrt(fan_in)
        w = jax.random.uniform(kw, shape_w, dtype, -bound, bound)
        b = jax.random.uniform(kb, shape_b, dtype, -bound, bound)
        return w, b

    w_enc, b_enc = lin(ks[0], ks[1], encoder_dim, (encoder_dim, attention_dim), (1, attention_dim))
    w_dec, b_dec = lin(ks[2], ks[3], decoder_dim, (decoder_dim, attention_dim), (1, attention_dim))
    w_full, b_full = lin(ks[4], ks[5], attention_dim, (1, attention_dim), (1, 1))
    return dict(w_enc=w_enc, b_enc=b_enc, w_dec=w_dec, b_dec=b_dec,
                w_full=w_full, b_full=b_full)


def attention_reference(encoder_out, decoder_hidden, p):
    att1 = encoder_out @ p["w_enc"] + p["b_enc"]                      # [B,N,A]
    att2 = decoder_hidden @ p["w_dec"] + p["b_dec"]                   # [B,A]
    h = jnp.maximum(att1 + att2[:, None, :], 0.0)                     # [B,N,A]
    att = (h @ p["w_full"].T + p["b_full"])[..., 0]                   # [B,N]
    alpha = jax.nn.softmax(att, axis=1)                               # [B,N]
    awe = (encoder_out * alpha[:, :, None]).sum(axis=1)               # [B,E]
    return awe, alpha


if __name__ == "__main__":
    B, N = 2, 16                     # batch, num pixel locations
    encoder_dim, decoder_dim, attention_dim = 32, 48, 64

    key = jax.random.PRNGKey(0)
    k_enc, k_dec, k_par = jax.random.split(key, 3)
    encoder_out = jax.random.normal(k_enc, (B, N, encoder_dim), jnp.float32)
    decoder_hidden = jax.random.normal(k_dec, (B, decoder_dim), jnp.float32)
    params = init_params(k_par, encoder_dim, decoder_dim, attention_dim)

    awe, alpha = attention_forward(encoder_out, decoder_hidden, params)
    jax.block_until_ready((awe, alpha))

    awe_ref, alpha_ref = attention_reference(encoder_out, decoder_hidden, params)
    assert awe.shape == (B, encoder_dim) and alpha.shape == (B, N)
    # Tolerance accounts for the bf16 MXU operands (f32 accumulate) in the att1 matmul;
    # softmax uses an exact denominator and awe math is f32.
    assert jnp.allclose(alpha, alpha_ref, atol=1e-2, rtol=1e-2), "alpha mismatch"
    assert jnp.allclose(awe, awe_ref, atol=1e-2, rtol=1e-2), "awe mismatch"

    print("KERNEL_OK")
</pallas_src>

<mosaic_0001>
module attributes {stable_mosaic.version = 11 : i64} {
  func.func @_attention_kernel(%arg0: i32, %arg1: memref<2x128x32xf32, #tpu.memory_space<vmem>>, %arg2: memref<2x48xf32, #tpu.memory_space<vmem>>, %arg3: memref<32x64xf32, #tpu.memory_space<vmem>>, %arg4: memref<1x64xf32, #tpu.memory_space<vmem>>, %arg5: memref<48x64xf32, #tpu.memory_space<vmem>>, %arg6: memref<1x64xf32, #tpu.memory_space<vmem>>, %arg7: memref<1x64xf32, #tpu.memory_space<vmem>>, %arg8: memref<2x32xf32, #tpu.memory_space<vmem>>, %arg9: memref<2x128xf32, #tpu.memory_space<vmem>>) attributes {dimension_semantics = [#tpu.dimension_semantics<parallel>], iteration_bounds = array<i64: 1>, scalar_prefetch = 0 : i64, scratch_operands = 0 : i64, tpu.core_type = #tpu.core_type<tc>, window_params = [{transform_indices = @transform_0, window_bounds = array<i64: 2, 128, 32>}, {transform_indices = @transform_1, window_bounds = array<i64: 2, 48>}, {pipeline_mode = #tpu.pipeline_mode<synchronous>, transform_indices = @transform_2, window_bounds = array<i64: 32, 64>}, {pipeline_mode = #tpu.pipeline_mode<synchronous>, transform_indices = @transform_3, window_bounds = array<i64: 1, 64>}, {pipeline_mode = #tpu.pipeline_mode<synchronous>, transform_indices = @transform_4, window_bounds = array<i64: 48, 64>}, {pipeline_mode = #tpu.pipeline_mode<synchronous>, transform_indices = @transform_5, window_bounds = array<i64: 1, 64>}, {pipeline_mode = #tpu.pipeline_mode<synchronous>, transform_indices = @transform_6, window_bounds = array<i64: 1, 64>}, {transform_indices = @transform_7, window_bounds = array<i64: 2, 32>}, {transform_indices = @transform_8, window_bounds = array<i64: 2, 128>}]} {
    %c0 = arith.constant 0 : index
    %c0_0 = arith.constant 0 : index
    %c0_1 = arith.constant 0 : index
    %0 = vector.load %arg1[%c0, %c0_0, %c0_1] : memref<2x128x32xf32, #tpu.memory_space<vmem>>, vector<2x128x32xf32>
    %c0_2 = arith.constant 0 : index
    %c0_3 = arith.constant 0 : index
    %1 = vector.load %arg2[%c0_2, %c0_3] : memref<2x48xf32, #tpu.memory_space<vmem>>, vector<2x48xf32>
    %2 = arith.truncf %0 : vector<2x128x32xf32> to vector<2x128x32xbf16>
    %3 = vector.shape_cast %2 : vector<2x128x32xbf16> to vector<256x32xbf16>
    %c0_4 = arith.constant 0 : index
    %c0_5 = arith.constant 0 : index
    %4 = vector.load %arg3[%c0_4, %c0_5] : memref<32x64xf32, #tpu.memory_space<vmem>>, vector<32x64xf32>
    %5 = arith.truncf %4 : vector<32x64xf32> to vector<32x64xbf16>
    %cst = arith.constant dense<0.000000e+00> : vector<256x64xf32>
    %6 = tpu.matmul %3, %5, %cst {dimension_numbers = #tpu.dot_dimension_numbers<[1], [0], [0], [1], [0, 0, 1, 1], [], []>} : vector<256x32xbf16>, vector<32x64xbf16>, vector<256x64xf32> -> vector<256x64xf32>
    %c0_6 = arith.constant 0 : index
    %c0_7 = arith.constant 0 : index
    %7 = vector.load %arg4[%c0_6, %c0_7] : memref<1x64xf32, #tpu.memory_space<vmem>>, vector<1x64xf32>
    %8 = vector.broadcast %7 : vector<1x64xf32> to vector<256x64xf32>
    %9 = arith.addf %6, %8 : vector<256x64xf32>
    %10 = vector.shape_cast %9 : vector<256x64xf32> to vector<2x128x64xf32>
    %c0_8 = arith.constant 0 : index
    %c0_9 = arith.constant 0 : index
    %11 = vector.load %arg5[%c0_8, %c0_9] : memref<48x64xf32, #tpu.memory_space<vmem>>, vector<48x64xf32>
    %cst_10 = arith.constant dense<0.000000e+00> : vector<2x64xf32>
    %12 = tpu.matmul %1, %11, %cst_10 {dimension_numbers = #tpu.dot_dimension_numbers<[1], [0], [0], [1], [0, 0, 1, 1], [], []>} : vector<2x48xf32>, vector<48x64xf32>, vector<2x64xf32> -> vector<2x64xf32>
    %c0_11 = arith.constant 0 : index
    %c0_12 = arith.constant 0 : index
    %13 = vector.load %arg6[%c0_11, %c0_12] : memref<1x64xf32, #tpu.memory_space<vmem>>, vector<1x64xf32>
    %14 = vector.broadcast %13 : vector<1x64xf32> to vector<2x64xf32>
    %15 = arith.addf %12, %14 : vector<2x64xf32>
    %16 = vector.shape_cast %15 : vector<2x64xf32> to vector<2x1x64xf32>
    %17 = vector.broadcast %16 : vector<2x1x64xf32> to vector<2x128x64xf32>
    %18 = arith.addf %10, %17 : vector<2x128x64xf32>
    %cst_13 = arith.constant 0.000000e+00 : f32
    %19 = vector.broadcast %cst_13 : f32 to vector<2x128x64xf32>
    %20 = arith.maximumf %18, %19 : vector<2x128x64xf32>
    %c0_14 = arith.constant 0 : index
    %c0_15 = arith.constant 0 : index
    %21 = vector.load %arg7[%c0_14, %c0_15] : memref<1x64xf32, #tpu.memory_space<vmem>>, vector<1x64xf32>
    %22 = vector.shape_cast %21 : vector<1x64xf32> to vector<1x1x64xf32>
    %23 = vector.broadcast %22 : vector<1x1x64xf32> to vector<2x128x64xf32>
    %24 = arith.mulf %20, %23 : vector<2x128x64xf32>
    %cst_16 = arith.constant dense<0.000000e+00> : vector<2x128xf32>
    %25 = vector.multi_reduction <add>, %24, %cst_16 [2] : vector<2x128x64xf32> to vector<2x128xf32>
    %26 = tpu.iota {dimensions = array<i32: 1>} : vector<2x128xi32>
    %c16_i32 = arith.constant 16 : i32
    %27 = vector.broadcast %c16_i32 : i32 to vector<2x128xi32>
    %28 = arith.cmpi slt, %26, %27 : vector<2x128xi32>
    %cst_17 = arith.constant -1.000000e+30 : f32
    %29 = vector.broadcast %cst_17 : f32 to vector<2x128xf32>
    %30 = arith.select %28, %25, %29 : vector<2x128xi1>, vector<2x128xf32>
    %cst_18 = arith.constant dense<0xFF800000> : vector<2xf32>
    %31 = vector.multi_reduction <maximumf>, %30, %cst_18 [1] : vector<2x128xf32> to vector<2xf32>
    %32 = vector.shape_cast %31 : vector<2xf32> to vector<2x1xf32>
    %33 = vector.broadcast %32 : vector<2x1xf32> to vector<2x128xf32>
    %34 = arith.subf %30, %33 : vector<2x128xf32>
    %35 = math.exp %34 : vector<2x128xf32>
    %cst_19 = arith.constant dense<0.000000e+00> : vector<2xf32>
    %36 = vector.multi_reduction <add>, %35, %cst_19 [1] : vector<2x128xf32> to vector<2xf32>
    %37 = vector.shape_cast %36 : vector<2xf32> to vector<2x1xf32>
    %cst_20 = arith.constant 1.000000e+00 : f32
    %38 = vector.broadcast %cst_20 : f32 to vector<2x1xf32>
    %39 = arith.divf %38, %37 : vector<2x1xf32>
    %40 = vector.broadcast %39 : vector<2x1xf32> to vector<2x128xf32>
    %41 = arith.mulf %35, %40 : vector<2x128xf32>
    %42 = vector.shape_cast %41 : vector<2x128xf32> to vector<2x128x1xf32>
    %43 = vector.broadcast %42 : vector<2x128x1xf32> to vector<2x128x32xf32>
    %44 = arith.mulf %0, %43 : vector<2x128x32xf32>
    %cst_21 = arith.constant dense<0.000000e+00> : vector<2x32xf32>
    %45 = vector.multi_reduction <add>, %44, %cst_21 [1] : vector<2x128x32xf32> to vector<2x32xf32>
    %c0_22 = arith.constant 0 : index
    %c0_23 = arith.constant 0 : index
    %46 = vector.load %arg8[%c0_22, %c0_23] : memref<2x32xf32, #tpu.memory_space<vmem>>, vector<2x32xf32>
    tpu.vector_store %arg8[%c0_22, %c0_23], %45 {strides = array<i32>} : memref<2x32xf32, #tpu.memory_space<vmem>>, vector<2x32xf32>,
    %c0_24 = arith.constant 0 : index
    %c0_25 = arith.constant 0 : index
    %47 = vector.load %arg9[%c0_24, %c0_25] : memref<2x128xf32, #tpu.memory_space<vmem>>, vector<2x128xf32>
    tpu.vector_store %arg9[%c0_24, %c0_25], %41 {strides = array<i32>} : memref<2x128xf32, #tpu.memory_space<vmem>>, vector<2x128xf32>,
    return
  }
  func.func @transform_0(%arg0: i32) -> (i32, i32, i32) {
    %c0_i32 = arith.constant 0 : i32
    %c0_i32_0 = arith.constant 0 : i32
    %c0_i32_1 = arith.constant 0 : i32
    return %arg0, %c0_i32, %c0_i32_0 : i32, i32, i32
  }
  func.func @transform_1(%arg0: i32) -> (i32, i32) {
    %c0_i32 = arith.constant 0 : i32
    %c0_i32_0 = arith.constant 0 : i32
    return %arg0, %c0_i32 : i32, i32
  }
  func.func @transform_2(%arg0: i32) -> (i32, i32) {
    %c0_i32 = arith.constant 0 : i32
    %c0_i32_0 = arith.constant 0 : i32
    %c0_i32_1 = arith.constant 0 : i32
    return %c0_i32, %c0_i32_0 : i32, i32
  }
  func.func @transform_3(%arg0: i32) -> (i32, i32) {
    %c0_i32 = arith.constant 0 : i32
    %c0_i32_0 = arith.constant 0 : i32
    %c0_i32_1 = arith.constant 0 : i32
    return %c0_i32, %c0_i32_0 : i32, i32
  }
  func.func @transform_4(%arg0: i32) -> (i32, i32) {
    %c0_i32 = arith.constant 0 : i32
    %c0_i32_0 = arith.constant 0 : i32
    %c0_i32_1 = arith.constant 0 : i32
    return %c0_i32, %c0_i32_0 : i32, i32
  }
  func.func @transform_5(%arg0: i32) -> (i32, i32) {
    %c0_i32 = arith.constant 0 : i32
    %c0_i32_0 = arith.constant 0 : i32
    %c0_i32_1 = arith.constant 0 : i32
    return %c0_i32, %c0_i32_0 : i32, i32
  }
  func.func @transform_6(%arg0: i32) -> (i32, i32) {
    %c0_i32 = arith.constant 0 : i32
    %c0_i32_0 = arith.constant 0 : i32
    %c0_i32_1 = arith.constant 0 : i32
    return %c0_i32, %c0_i32_0 : i32, i32
  }
  func.func @transform_7(%arg0: i32) -> (i32, i32) {
    %c0_i32 = arith.constant 0 : i32
    %c0_i32_0 = arith.constant 0 : i32
    return %arg0, %c0_i32 : i32, i32
  }
  func.func @transform_8(%arg0: i32) -> (i32, i32) {
    %c0_i32 = arith.constant 0 : i32
    %c0_i32_0 = arith.constant 0 : i32
    return %arg0, %c0_i32 : i32, i32
  }
}

</mosaic_0001>

<bundles_post_ra>
// kernel: tpu_custom_call.1
= control target key start
LH: loop header
LB: loop body
LE: loop exit
PB: predicated region body
PF: predicated region fallthrough
CT: control target
= control target key end

     0   :  { %14 = vsyncpa [#allocation3], 0  ;;  %vm93_vm0 = vcmask 261120   ;;  %v1333_v26 = vmov 0.0|0.0   ;;  %s2105_s0 = inlined_call_operand.vmem [shape: f32[2,128,32], index: 0, kind: input, shape index: {}]   ;;  %s2106_s1 = inlined_call_operand.vmem [shape: f32[2,48], index: 1, kind: input, shape index: {}]   ;;  %s2107_s2 = inlined_call_operand.vmem [shape: f32[32,64], index: 2, kind: input, shape index: {}]   ;;  %s2108_s3 = inlined_call_operand.vmem [shape: f32[1,64], index: 3, kind: input, shape index: {}]   ;;  %s2109_s4 = inlined_call_operand.vmem [shape: f32[48,64], index: 4, kind: input, shape index: {}]   ;;  %s2110_s5 = inlined_call_operand.vmem [shape: f32[1,64], index: 5, kind: input, shape index: {}]   ;;  %s2111_s6 = inlined_call_operand.vmem [shape: f32[1,64], index: 6, kind: input, shape index: {}]   ;;  %s2112_s7 = inlined_call_operand.hbm [shape: f32[2,32], index: 7, kind: output, shape index: {0}]   ;;  %s2113_s8 = inlined_call_operand.hbm [shape: f32[2,128], index: 8, kind: output, shape index: {1}]  }
   0x1   :  { %v80_v0 = vld [vmem:[%s2107_s2] sm:$0xff]  ;;  %v81_v1 = vld [vmem:[%s2107_s2 + $0x8] sm:$0xff]  ;;  %v82_v2 = vld [vmem:[%s2107_s2 + $0x10] sm:$0xff] }
   0x2   :  { %v84_v3 = vpack.c.bf16 %v81_v1, %v80_v0  ;;  %v83_v4 = vld [vmem:[%s2107_s2 + $0x18] sm:$0xff]  ;;  %v31_v5 = vld [vmem:[%s2105_s0] sm:$0xff]  ;;  %v32_v6 = vld [vmem:[%s2105_s0 + $0x8] sm:$0xff] }
   0x3   :  { %v85_v7 = vpack.c.bf16 %v83_v4, %v82_v2  ;;  %v64_v8 = vpack.c.bf16 %v32_v6, %v31_v5  ;;  %v51_v9 = vld [vmem:[%s2105_s0 + $0xa0] sm:$0xff]  ;;  %v52_v10 = vld [vmem:[%s2105_s0 + $0xa8] sm:$0xff]  ;;  %v33_v12 = vld [vmem:[%s2105_s0 + $0x10] sm:$0xff] }
   0x4   :  { %1183 = vmatprep.subr.bf16.mxu0 %v84_v3  ;;  %1243 = vmatprep.subr.bf16.mxu1 %v84_v3  ;;  %v74_v11 = vpack.c.bf16 %v52_v10, %v51_v9  ;;  %v34_v13 = vld [vmem:[%s2105_s0 + $0x18] sm:$0xff]  ;;  %v53_v14 = vld [vmem:[%s2105_s0 + $0xb0] sm:$0xff]  ;;  %v303_v16 = vld [vmem:[%s2109_s4] sm:$0xff] }
   0x5   :  { %1184 = vmatpush3.bf16.msra.mxu0 %v84_v3  ;;  %1245 = vmatpush3.bf16.msra.mxu1 %v84_v3  ;;  %v54_v15 = vld [vmem:[%s2105_s0 + $0xb8] sm:$0xff]  ;;  %v304_v17 = vld [vmem:[%s2109_s4 + $0x8] sm:$0xff]  ;;  %v35_v18 = vld [vmem:[%s2105_s0 + $0x20] sm:$0xff]  ;;  %v65_v22 = vpack.c.bf16 %v34_v13, %v33_v12 }
   0x6   :  { %1185 = vmatprep.subr.bf16.mxu0 %v85_v7  ;;  %1244 = vmatprep.subr.bf16.mxu1 %v85_v7  ;;  %v36_v19 = vld [vmem:[%s2105_s0 + $0x28] sm:$0xff]  ;;  %v55_v20 = vld [vmem:[%s2105_s0 + $0xc0] sm:$0xff]  ;;  %v75_v23 = vpack.c.bf16 %v54_v15, %v53_v14  ;;  %v1235_v24 = vpack.c.bf16 %v304_v17, %v303_v16  ;;  %v305_v28 = vld [vmem:[%s2109_s4 + $0x10] sm:$0xff] }
   0x7   :  { %1187 = vmatprep.mubr.msk.bf16.mxu0 %vm93_vm0, %v64_v8  ;;  %1207 = vmatprep.mubr.msk.bf16.mxu1 %vm93_vm0, %v74_v11  ;;  %v56_v21 = vld [vmem:[%s2105_s0 + $0xc8] sm:$0xff]  ;;  %v66_v25 = vpack.c.bf16 %v36_v19, %v35_v18  ;;  %v306_v29 = vld [vmem:[%s2109_s4 + $0x18] sm:$0xff]  ;;  %v37_v30 = vld [vmem:[%s2105_s0 + $0x30] sm:$0xff] }
   0x8   :  { %v76_v27 = vpack.c.bf16 %v56_v21, %v55_v20  ;;  %v38_v31 = vld [vmem:[%s2105_s0 + $0x38] sm:$0xff]  ;;  %v57_v32 = vld [vmem:[%s2105_s0 + $0xd0] sm:$0xff]  ;;  %v1238_v34 = vpack.c.bf16 %v306_v29, %v305_v28  ;;  %v39_v35 = vld [vmem:[%s2105_s0 + $0x40] sm:$0xff] }
   0x9   :  { %1186 = vmatpush3.bf16.msra.mxu0 %v85_v7  ;;  %1246 = vmatpush3.bf16.msra.mxu1 %v85_v7  ;;  %v58_v33 = vld [vmem:[%s2105_s0 + $0xd8] sm:$0xff]  ;;  %v40_v36 = vld [vmem:[%s2105_s0 + $0x48] sm:$0xff]  ;;  %v59_v37 = vld [vmem:[%s2105_s0 + $0xe0] sm:$0xff] }
   0xa   :  { %1234 = vmatprep.subr.bf16.mxu1 %v1333_v26  ;;  %v60_v38 = vld [vmem:[%s2105_s0 + $0xe8] sm:$0xff]  ;;  %v307_v39 = vld [vmem:[%s2109_s4 + $0x20] sm:$0xff] }
   0xb   :  { %v308_v40 = vld [vmem:[%s2109_s4 + $0x28] sm:$0xff] }
   0xc   :  { %1188 = vmatmul.mubr.msk.bf16.vlgmr.msra.gmra.mrb[0].mxu0 %vm93_vm0, %v65_v22  ;;  %1208 = vmatmul.mubr.msk.bf16.vlgmr.msra.gmra.mrb[0].mxu1 %vm93_vm0, %v75_v23 }
   0xd   :  { %1236 = vmatpush3.bf16.msra.mxu1 %v1235_v24  ;;  %1191 = vmatprep.mubr.msk.bf16.mxu0 %vm93_vm0, %v66_v25 }
   0xe   :  { %1211 = vmatprep.mubr.msk.bf16.mxu1 %vm93_vm0, %v76_v27  ;;  %1237 = vmatprep.subr.bf16.mxu1 %v1333_v26 }
   0xf   :  { %15 = vsyncpa [#allocation5], 0  ;;  %v67_v41 = vpack.c.bf16 %v38_v31, %v37_v30  ;;  %v77_v42 = vpack.c.bf16 %v58_v33, %v57_v32  ;;  %v68_v43 = vpack.c.bf16 %v40_v36, %v39_v35  ;;  %v78_v44 = vpack.c.bf16 %v60_v38, %v59_v37  ;;  %v41_v46 = vld [vmem:[%s2105_s0 + $0x50] sm:$0xff]  ;;  %v42_v47 = vld [vmem:[%s2105_s0 + $0x58] sm:$0xff] }
  0x10   :  { %v1241_v45 = vpack.c.bf16 %v308_v40, %v307_v39  ;;  %v61_v48 = vld [vmem:[%s2105_s0 + $0xf0] sm:$0xff]  ;;  %v62_v49 = vld [vmem:[%s2105_s0 + $0xf8] sm:$0xff]  ;;  %v43_v50 = vld [vmem:[%s2105_s0 + $0x60] sm:$0xff]  ;;  %v69_v52 = vpack.c.bf16 %v42_v47, %v41_v46  ;;  %vm1334_vm1 = vmmov 0   ;;  %v1335_v55 = vmov 0.0  }
  0x11   :  { %1239 = vmatpush3.bf16.msra.mxu1 %v1238_v34  ;;  %v44_v51 = vld [vmem:[%s2105_s0 + $0x68] sm:$0xff]  ;;  %v79_v53 = vpack.c.bf16 %v62_v49, %v61_v48  ;;  %v45_v56 = vld [vmem:[%s2105_s0 + $0x70] sm:$0xff]  ;;  %v46_v57 = vld [vmem:[%s2105_s0 + $0x78] sm:$0xff]  ;;  %vm316_vm2 = vcmask 392192   ;;  %v1336_v18 = vmov 1966171168   ;;  %v394_v20 = vlaneseq }
  0x12   :  { %1240 = vmatprep.subr.bf16.mxu1 %v1333_v26  ;;  %v70_v54 = vpack.c.bf16 %v44_v51, %v43_v50  ;;  %v1514_v58 = vld [vmem:[%s2105_s0 + $0x80] sm:$0xff]  ;;  %v1519_v59 = vld [vmem:[%s2105_s0 + $0x88] sm:$0xff]  ;;  %v71_v60 = vpack.c.bf16 %v46_v57, %v45_v56  ;;  %v1531_v63 = vld [vmem:[%s2105_s0 + $0x90] sm:$0xff]  ;;  %v392_v19 = vunpack.c.l.s4 %v1336_v18  ;;  %vm526_vm3 = vcmask 523264  }
  0x13   :  { %v63_v61 = vld [vmem:[%s2106_s1] sm:$0x3]  ;;  %v72_v62 = vpack.c.bf16 %v1519_v59, %v1514_v58  ;;  %v1536_v0 = vld [vmem:[%s2105_s0 + $0x98] sm:$0xff]  ;;  %v1580_v30 = vshrl.u32 %v394_v20, 7  ;;  %vm667_vm4 = vcmask 130112   ;;  %vm674_vm5 = vcmask 195712  }
  0x14   :  { %1192 = vmatmul.mubr.msk.bf16.gmra.mrb[4].mxu0 %vm93_vm0, %v67_v41  ;;  %1212 = vmatmul.mubr.msk.bf16.gmra.mrb[4].mxu1 %vm93_vm0, %v77_v42  ;;  %v73_v1 = vpack.c.bf16 %v1536_v0, %v1531_v63  ;;  %v393_v29 = vunpack.c.0.s8 %v392_v19  ;;  %v1155_v31 = vld [vmem:[%s2110_s5] ss:$0 sm:$0xff]  ;;  %vm681_vm6 = vcmask 261312   ;;  %vm688_vm7 = vcmask 326912  }
  0x15   :  { %1195 = vmatprep.mubr.msk.bf16.mxu0 %vm93_vm0, %v68_v43  ;;  %1215 = vmatprep.mubr.msk.bf16.mxu1 %vm93_vm0, %v78_v44  ;;  %v1589_v40 = vsub.s32 0, %v1580_v30  ;;  %v1594_v42 = vld [vmem:[%s2108_s3] ss:$0 sm:$0xff]  ;;  %vm695_vm8 = vcmask 392512   ;;  %vm702_vm9 = vcmask 458112   ;;  %vm709_vm10 = vcmask 523712  }
  0x16   :  { %1242 = vmatpush3.bf16.msra.mxu1 %v1241_v45  ;;  %v396_v32 = vsub.s32 %v393_v29, %v1580_v30  ;;  %vm716_vm11 = vcmask 589312   ;;  %vm723_vm12 = vcmask 654912   ;;  %vm730_vm13 = vcmask 720512  }
  0x17   :  { %vm737_vm14 = vcmask 786112   ;;  %vm744_vm15 = vcmask 851712  }
  0x1c   :  { %1196 = vmatmul.mubr.msk.bf16.gmra.mrb[8].mxu0 %vm93_vm0, %v69_v52  ;;  %1216 = vmatmul.mubr.msk.bf16.gmra.mrb[8].mxu1 %vm93_vm0, %v79_v53 }
  0x1d   :  { %1199 = vmatprep.mubr.msk.bf16.mxu0 %vm93_vm0, %v70_v54  ;;  %1231 = vmatprep.mubr.msk.f32.mxu1 %vm1334_vm1, %v1335_v55  ;;  %vm751_vm1 = vcmask 917312  }
  0x24   :  { %1200 = vmatmul.mubr.msk.bf16.gmra.mrb[12].mxu0 %vm93_vm0, %v71_v60  ;;  %1232 = vmatmul.mubr.msk.f32.vlgmr.msra.gmra.mrb[12].mxu1 %vm316_vm2, %v63_v61  ;;  %vm758_vm2 = vcmask 982912  }
  0x25   :  { %1203 = vmatprep.mubr.msk.bf16.mxu0 %vm93_vm0, %v72_v62 }
  0x2c   :  { %1204 = vmatmul.mubr.msk.bf16.gmra.mrb[16].mxu0 %vm93_vm0, %v73_v1 }
  0xdf   :  { %v1189_v2 = vpop.f32.mrb[0].mxu0  ;;  %v1209_v3 = vpop.f32.mrb[0].mxu1 }
  0xe0   :  { %v176_v4 = vpop.f32.mrb[1].mxu0  ;;  %v256_v5 = vpop.f32.mrb[1].mxu1  ;;  %v265_v18 = vadd.f32 %v1209_v3, %v1594_v42 }
  0xe1   :  { %v1541_v6 = vpop.f32.mrb[2].mxu0  ;;  %v1543_v7 = vpop.f32.mrb[2].mxu1  ;;  %v177_v50 = vadd.f32 %v1594_v42, %v176_v4  ;;  %v257_v19 = vadd.f32 %v1594_v42, %v256_v5 }
  0xe2   :  { %v179_v8 = vpop.f32.mrb[3].mxu0  ;;  %v1545_v9 = vpop.f32.mrb[3].mxu1 }
  0xe3   :  { %v180_v51 = vadd.f32 %v1594_v42, %v179_v8  ;;  %v185_v8 = vadd.f32 %v1189_v2, %v1594_v42 }
  0xe7   :  { %v1547_v10 = vpop.f32.mrb[4].mxu0  ;;  %v1549_v11 = vpop.f32.mrb[4].mxu1 }
  0xe8   :  { %v1551_v12 = vpop.f32.mrb[5].mxu0  ;;  %v1553_v13 = vpop.f32.mrb[5].mxu1 }
  0xe9   :  { %v1555_v14 = vpop.f32.mrb[6].mxu0  ;;  %v1557_v15 = vpop.f32.mrb[6].mxu1 }
  0xea   :  { %v1559_v16 = vpop.f32.mrb[7].mxu0  ;;  %v1561_v17 = vpop.f32.mrb[7].mxu1 }
  0xef   :  { %v1563_v21 = vpop.f32.mrb[8].mxu0  ;;  %v1565_v22 = vpop.f32.mrb[8].mxu1 }
  0xf0   :  { %v1567_v23 = vpop.f32.mrb[9].mxu0  ;;  %v1569_v24 = vpop.f32.mrb[9].mxu1 }
  0xf1   :  { %v1571_v25 = vpop.f32.mrb[10].mxu0  ;;  %v1573_v26 = vpop.f32.mrb[10].mxu1 }
  0xf2   :  { %v1575_v27 = vpop.f32.mrb[11].mxu0  ;;  %v1577_v28 = vpop.f32.mrb[11].mxu1 }
  0xf7   :  { %v1586_v33 = vpop.f32.mrb[12].mxu0  ;;  %v386_v34 = vpop.f32.mrb[12].mxu1 }
  0xf8   :  { %v387_v35 = vadd.f32 %v1155_v31, %v386_v34  ;;  %v224_v36 = vpop.f32.mrb[13].mxu0  ;;  %v1233_v37 = vpop.f32.mrb[13].mxu1 }
  0xf9   :  { %v1202_v38 = vpop.f32.mrb[14].mxu0  ;;  %v225_v45 = vadd.f32 %v1594_v42, %v224_v36 }
  0xfa   :  { %v397_v39 = vrot.slane %v387_v35, %v396_v32  ;;  %v227_v41 = vpop.f32.mrb[15].mxu0  ;;  %v236_v48 = vadd.f32 %v1202_v38, %v1594_v42 }
  0xfb   :  { %v228_v49 = vadd.f32 %v1594_v42, %v227_v41 }
  0xfc   :  { %v398_v43 = vcombine.high %v397_v39, %v397_v39  ;;  %v405_v44 = vrot.slane %v397_v39, %v396_v32  ;;  %v260_v39 = vadd.f32 %v1594_v42, %v1545_v9 }
  0xfe   :  { %v412_v46 = vrot.slane %v398_v43, %v396_v32  ;;  %v1598_v47 = vrot.slane %v405_v44, %v1589_v40  ;;  %v1627_v32 = vld [vmem:[%s2111_s6] ss:$0 sm:$0xff]  ;;  %s1337_s6 = smov [#allocation4]  }
  0xff   :  { %v1205_v52 = vpop.f32.mrb[16].mxu0  ;;  %s1126_s22 = sshll.u32 %s1337_s6, 4  ;;  %s1127_s22 = int_to_ptr.vmem [resolvable:$true] %s1126_s22 }
 0x100   :  { %v1605_v53 = vrot.slane %v412_v46, %v1589_v40  ;;  %v1608_v54 = vadd.f32 %v1598_v47, %v225_v45  ;;  %v1611_v55 = vadd.f32 %v1598_v47, %v236_v48  ;;  %v1614_v56 = vadd.f32 %v1598_v47, %v228_v49  ;;  %v240_v57 = vpop.f32.mrb[17].mxu0  ;;  %s1285_s23 = scalar_lea.vmem %s1127_s22, 32  ;;  %p1290_p1 = scmp.lt.s32.totalorder %s1127_s22, %s1127_s22 }
 0x101   :  { %v249_v60 = vadd.f32 %v1205_v52, %v1594_v42  ;;  %v241_v61 = vadd.f32 %v1594_v42, %v240_v57  ;;  %v1206_v62 = vpop.f32.mrb[18].mxu0  ;;  %v423_v1 = vadd.f32 %v1598_v47, %v177_v50  ;;  %v424_v4 = vadd.f32 %v1598_v47, %v180_v51  ;;  %p1286_p0 = scmp.ne.s32.totalorder %s1127_s22, %s1285_s23  ;;  %p1291_p2 = scmp.lt.s32.totalorder %s1285_s23, %s1285_s23 }
 0x102   :  { %v252_v29 = vadd.f32 %v1206_v62, %v1594_v42  ;;  %v243_v31 = vpop.f32.mrb[19].mxu0  ;;  %v443_v37 = vadd.f32 %v1605_v53, %v257_v19  ;;  %v425_v38 = vadd.f32 %v1598_v47, %v185_v8  ;;  %v188_v45 = vadd.f32 %v1541_v6, %v1594_v42 }
 0x103   :  { %v441_v34 = vadd.f32 %v1605_v53, %v249_v60  ;;  %v1631_v35 = vadd.f32 %v1605_v53, %v241_v61  ;;  %v244_v36 = vadd.f32 %v1594_v42, %v243_v31  ;;  %v455_v2 = vmax.f32 %v423_v1, 0.0  ;;  %p1292_p3 = por %p1291_p2, %p1290_p1 }
 0x104   :  { %v1635_v3 = vadd.f32 %v1605_v53, %v252_v29  ;;  %v456_v5 = vmax.f32 %v424_v4, 0.0  ;;  %v193_v46 = vadd.f32 %v1594_v42, %v1551_v12  ;;  %v475_v49 = vmax.f32 %v443_v37, 0.0 }
 0x105   :  { %v473_v41 = vmax.f32 %v441_v34, 0.0  ;;  %v1642_v43 = vadd.f32 %v1605_v53, %v244_v36  ;;  %v494_v44 = vmul.f32 %v1627_v32, %v455_v2  ;;  %v457_v9 = vmax.f32 %v425_v38, 0.0  ;;  %p1293_p4 = pnand %p1292_p3, %p1286_p0 }
 0x106   :  { %v495_v48 = vmul.f32 %v1627_v32, %v456_v5  ;;  %v444_v52 = vadd.f32 %v1605_v53, %v260_v39  ;;  %v268_v57 = vadd.f32 %v1543_v7, %v1594_v42  ;;  %v196_v60 = vadd.f32 %v1594_v42, %v1559_v16 }
 0x107   :  { %v527_v50 = vsel %vm526_vm3, %v494_v44, 0.0  ;;  %v512_v51 = vmul.f32 %v1627_v32, %v473_v41  ;;  %v514_v6 = vmul.f32 %v1627_v32, %v475_v49  ;;  %v426_v12 = vadd.f32 %v1598_v47, %v188_v45 }
 0x108   :  { %528 = vadd.xlane.f32.xlu0 %v527_v50  ;;  %v476_v62 = vmax.f32 %v444_v52, 0.0  ;;  %v445_v1 = vadd.f32 %v1605_v53, %v265_v18  ;;  %v427_v4 = vadd.f32 %v1598_v47, %v193_v46  ;;  %v201_v8 = vadd.f32 %v1547_v10, %v1594_v42 }
 0x109   :  { %v581_v61 = vsel %vm526_vm3, %v512_v51, 0.0  ;;  %v273_v7 = vadd.f32 %v1594_v42, %v1553_v13  ;;  %v446_v16 = vadd.f32 %v1605_v53, %v268_v57  ;;  %v530_v19 = vsel %vm526_vm3, %v495_v48, 0.0 }
 0x10a   :  { %582 = vadd.xlane.f32.xlu1 %v581_v61  ;;  %v496_v29 = vmul.f32 %v1627_v32, %v457_v9  ;;  %v458_v31 = vmax.f32 %v426_v12, 0.0  ;;  %v428_v34 = vadd.f32 %v1598_v47, %v196_v60  ;;  %v429_v36 = vadd.f32 %v1598_v47, %v201_v8 }
 0x10b   :  { %v447_v18 = vadd.f32 %v1605_v53, %v273_v7  ;;  %v276_v10 = vadd.f32 %v1594_v42, %v1561_v17  ;;  %v587_v13 = vsel %vm526_vm3, %v514_v6, 0.0  ;;  %v515_v2 = vmul.f32 %v1627_v32, %v476_v62 }
 0x10c   :  { %531 = vadd.xlane.f32.xlu0 %v530_v19  ;;  %v477_v5 = vmax.f32 %v445_v1, 0.0  ;;  %v281_v37 = vadd.f32 %v1549_v11, %v1594_v42  ;;  %v204_v38 = vadd.f32 %v1555_v14, %v1594_v42  ;;  %v209_v39 = vadd.f32 %v1594_v42, %v1567_v23 }
 0x10d   :  { %v533_v41 = vsel %vm526_vm3, %v496_v29, 0.0  ;;  %v497_v44 = vmul.f32 %v1627_v32, %v458_v31  ;;  %v459_v17 = vmax.f32 %v427_v4, 0.0  ;;  %v448_v45 = vadd.f32 %v1605_v53, %v276_v10 }
 0x10e   :  { %588 = vadd.xlane.f32.xlu1 %v587_v13  ;;  %v284_v46 = vadd.f32 %v1557_v15, %v1594_v42  ;;  %v212_v11 = vadd.f32 %v1594_v42, %v1575_v27  ;;  %v478_v48 = vmax.f32 %v446_v16, 0.0  ;;  %v430_v14 = vadd.f32 %v1598_v47, %v204_v38 }
 0x10f   :  { %v590_v23 = vsel %vm526_vm3, %v515_v2, 0.0  ;;  %v516_v49 = vmul.f32 %v1627_v32, %v477_v5  ;;  %v449_v50 = vadd.f32 %v1605_v53, %v281_v37  ;;  %v431_v51 = vadd.f32 %v1598_v47, %v209_v39 }
 0x110   :  { %534 = vadd.xlane.f32.xlu0 %v533_v41  ;;  %v217_v9 = vadd.f32 %v1563_v21, %v1594_v42  ;;  %v450_v15 = vadd.f32 %v1605_v53, %v284_v46  ;;  %v536_v27 = vsel %vm526_vm3, %v497_v44, 0.0  ;;  %v498_v52 = vmul.f32 %v1627_v32, %v459_v17 }
 0x111   :  { %v460_v57 = vmax.f32 %v428_v34, 0.0  ;;  %v432_v60 = vadd.f32 %v1598_v47, %v212_v11  ;;  %v593_v12 = vsel %vm526_vm3, %v516_v49, 0.0  ;;  %v517_v61 = vmul.f32 %v1627_v32, %v478_v48 }
 0x112   :  { %591 = vadd.xlane.f32.xlu1 %v590_v23  ;;  %v433_v6 = vadd.f32 %v1598_v47, %v217_v9  ;;  %v479_v62 = vmax.f32 %v447_v18, 0.0  ;;  %v220_v21 = vadd.f32 %v1571_v25, %v1594_v42  ;;  %v461_v1 = vmax.f32 %v429_v36, 0.0 }
 0x113   :  { %v289_v4 = vadd.f32 %v1594_v42, %v1569_v24  ;;  %v539_v8 = vsel %vm526_vm3, %v498_v52, 0.0  ;;  %v499_v7 = vmul.f32 %v1627_v32, %v460_v57  ;;  %v292_v16 = vadd.f32 %v1594_v42, %v1577_v28 }
 0x114   :  { %537 = vadd.xlane.f32.xlu0 %v536_v27  ;;  %v233_v19 = vadd.f32 %v1586_v33, %v1594_v42  ;;  %v434_v29 = vadd.f32 %v1598_v47, %v220_v21  ;;  %v596_v25 = vsel %vm526_vm3, %v517_v61, 0.0  ;;  %v518_v31 = vmul.f32 %v1627_v32, %v479_v62 }
 0x115   :  { %v480_v34 = vmax.f32 %v448_v45, 0.0  ;;  %v451_v24 = vadd.f32 %v1605_v53, %v289_v4  ;;  %v297_v18 = vadd.f32 %v1565_v22, %v1594_v42  ;;  %v300_v36 = vadd.f32 %v1573_v26, %v1594_v42 }
 0x116   :  { %594 = vadd.xlane.f32.xlu1 %v593_v12  ;;  %v500_v28 = vmul.f32 %v1627_v32, %v461_v1  ;;  %v542_v33 = vsel %vm526_vm3, %v499_v7, 0.0  ;;  %v462_v10 = vmax.f32 %v430_v14, 0.0  ;;  %v1724_v13 = vadd.f32 %v1605_v53, %v292_v16 }
 0x117   :  { %v1727_v2 = vadd.f32 %v1598_v47, %v233_v19  ;;  %v1730_v5 = vadd.f32 %v1605_v53, %v297_v18  ;;  %v599_v22 = vsel %vm526_vm3, %v518_v31, 0.0  ;;  %v519_v26 = vmul.f32 %v1627_v32, %v480_v34 }
 0x118   :  { %540 = vadd.xlane.f32.xlu0 %v539_v8  ;;  %v481_v42 = vmax.f32 %v449_v50, 0.0  ;;  %v1735_v37 = vadd.f32 %v1605_v53, %v300_v36  ;;  %v545_v38 = vsel %vm526_vm3, %v500_v28, 0.0  ;;  %v501_v39 = vmul.f32 %v1627_v32, %v462_v10 }
 0x119   :  { %v463_v41 = vmax.f32 %v431_v51, 0.0  ;;  %v602_v47 = vsel %vm526_vm3, %v519_v26, 0.0  ;;  %v482_v17 = vmax.f32 %v450_v15, 0.0  ;;  %v464_v11 = vmax.f32 %v432_v60, 0.0 }
 0x11a   :  { %597 = vadd.xlane.f32.xlu1 %v596_v25  ;;  %v520_v44 = vmul.f32 %v1627_v32, %v481_v42  ;;  %v548_v45 = vsel %vm526_vm3, %v501_v39, 0.0  ;;  %v471_v53 = vmax.f32 %v1631_v35, 0.0  ;;  %v465_v50 = vmax.f32 %v433_v6, 0.0 }
 0x11b   :  { %v502_v46 = vmul.f32 %v1627_v32, %v463_v41  ;;  %v521_v14 = vmul.f32 %v1627_v32, %v482_v17  ;;  %v503_v49 = vmul.f32 %v1627_v32, %v464_v11  ;;  %v474_v51 = vmax.f32 %v1635_v3, 0.0 }
 0x11c   :  { %543 = vadd.xlane.f32.xlu0 %v542_v33  ;;  %v605_v48 = vsel %vm526_vm3, %v520_v44, 0.0  ;;  %v510_v15 = vmul.f32 %v1627_v32, %v471_v53  ;;  %v504_v27 = vmul.f32 %v1627_v32, %v465_v50  ;;  %v466_v52 = vmax.f32 %v434_v29, 0.0 }
 0x11d   :  { %v551_v23 = vsel %vm526_vm3, %v502_v46, 0.0  ;;  %v608_v9 = vsel %vm526_vm3, %v521_v14, 0.0  ;;  %v554_v35 = vsel %vm526_vm3, %v503_v49, 0.0  ;;  %v472_v57 = vmax.f32 %v1642_v43, 0.0 }
 0x11e   :  { %600 = vadd.xlane.f32.xlu1 %v599_v22  ;;  %v575_v60 = vsel %vm526_vm3, %v510_v15, 0.0  ;;  %v513_v6 = vmul.f32 %v1627_v32, %v474_v51  ;;  %v467_v3 = vmax.f32 %v1608_v54, 0.0  ;;  %v557_v12 = vsel %vm526_vm3, %v504_v27, 0.0 }
 0x11f   :  { %v505_v61 = vmul.f32 %v1627_v32, %v466_v52  ;;  %v511_v21 = vmul.f32 %v1627_v32, %v472_v57  ;;  %v483_v1 = vmax.f32 %v451_v24, 0.0  ;;  %v468_v43 = vmax.f32 %v1614_v56, 0.0 }
 0x120   :  { %546 = vadd.xlane.f32.xlu0 %v545_v38  ;;  %v584_v62 = vsel %vm526_vm3, %v513_v6, 0.0  ;;  %v506_v8 = vmul.f32 %v1627_v32, %v467_v3  ;;  %v484_v16 = vmax.f32 %v1724_v13, 0.0  ;;  %v469_v25 = vmax.f32 %v1727_v2, 0.0 }
 0x121   :  { %v560_v4 = vsel %vm526_vm3, %v505_v61, 0.0  ;;  %v578_v54 = vsel %vm526_vm3, %v511_v21, 0.0  ;;  %v522_v7 = vmul.f32 %v1627_v32, %v483_v1  ;;  %v507_v29 = vmul.f32 %v1627_v32, %v468_v43 }
 0x122   :  { %603 = vadd.xlane.f32.xlu1 %v602_v47  ;;  %v563_v19 = vsel %vm526_vm3, %v506_v8, 0.0  ;;  %v523_v31 = vmul.f32 %v1627_v32, %v484_v16  ;;  %v485_v34 = vmax.f32 %v1730_v5, 0.0  ;;  %v470_v24 = vmax.f32 %v1611_v55, 0.0 }
 0x123   :  { %v611_v56 = vsel %vm526_vm3, %v522_v7, 0.0  ;;  %v566_v18 = vsel %vm526_vm3, %v507_v29, 0.0  ;;  %v508_v36 = vmul.f32 %v1627_v32, %v469_v25  ;;  %v486_v10 = vmax.f32 %v1735_v37, 0.0 }
 0x124   :  { %549 = vadd.xlane.f32.xlu0 %v548_v45  ;;  %v614_v28 = vsel %vm526_vm3, %v523_v31, 0.0  ;;  %v524_v33 = vmul.f32 %v1627_v32, %v485_v34  ;;  %v509_v2 = vmul.f32 %v1627_v32, %v470_v24  ;;  %v1818_v49 = vand.u32 127, %v394_v20 }
 0x125   :  { %v569_v13 = vsel %vm526_vm3, %v508_v36, 0.0  ;;  %v525_v55 = vmul.f32 %v1627_v32, %v486_v10 }
 0x126   :  { %606 = vadd.xlane.f32.xlu1 %v605_v48  ;;  %v617_v5 = vsel %vm526_vm3, %v524_v33, 0.0  ;;  %v572_v22 = vsel %vm526_vm3, %v509_v2, 0.0  ;;  %v683_v27 = vadd.s32 4294967264, %v1818_v49  ;;  %v660_v57 = vsub.s32 %v1818_v49, %v1580_v30 }
 0x127   :  { %v620_v26 = vsel %vm526_vm3, %v525_v55, 0.0  ;;  %v676_v6 = vadd.s32 4294967272, %v1818_v49  ;;  %v697_v3 = vadd.s32 4294967248, %v1818_v49  ;;  %v711_v21 = vadd.s32 4294967232, %v1818_v49 }
 0x128   :  { %552 = vadd.xlane.f32.xlu0 %v551_v23  ;;  %v1841_v1 = vsub.s32 %v683_v27, %v1580_v30  ;;  %v718_v43 = vadd.s32 4294967224, %v1818_v49  ;;  %v732_v8 = vadd.s32 4294967208, %v1818_v49  ;;  %v739_v16 = vadd.s32 4294967200, %v1818_v49 }
 0x129   :  { %v700_v29 = vsub.s32 %v697_v3, %v1580_v30  ;;  %v753_v31 = vadd.s32 4294967184, %v1818_v49  ;;  %v1860_v24 = vsub.s32 %v711_v21, %v1580_v30  ;;  %v760_v10 = vadd.s32 4294967176, %v1818_v49 }
 0x12a   :  { %609 = vadd.xlane.f32.xlu1 %v608_v9  ;;  %v669_v9 = vadd.s32 4294967280, %v1818_v49  ;;  %v1874_v55 = vsub.s32 %v739_v16, %v1580_v30  ;;  %vm765_vm3 = vcmask 1048512  }
 0x12b   :  { %v1884_v27 = vsub.s32 %v753_v31, %v1580_v30 }
 0x12c   :  { %555 = vadd.xlane.f32.xlu0 %v554_v35  ;;  %v662_v35 = vadd.s32 4294967288, %v1818_v49  ;;  %v672_v20 = vsub.s32 %v669_v9, %v1580_v30 }
 0x12e   :  { %576 = vadd.xlane.f32.xlu1 %v575_v60  ;;  %v690_v60 = vadd.s32 4294967256, %v1818_v49  ;;  %v665_v61 = vsub.s32 %v662_v35, %v1580_v30 }
 0x130   :  { %558 = vadd.xlane.f32.xlu0 %v557_v12  ;;  %v1847_v7 = vsub.s32 %v690_v60, %v1580_v30 }
 0x132   :  { %585 = vadd.xlane.f32.xlu1 %v584_v62  ;;  %v704_v62 = vadd.s32 4294967240, %v1818_v49 }
 0x134   :  { %561 = vadd.xlane.f32.xlu0 %v560_v4  ;;  %v725_v4 = vadd.s32 4294967216, %v1818_v49  ;;  %v1857_v34 = vsub.s32 %v704_v62, %v1580_v30 }
 0x136   :  { %579 = vadd.xlane.f32.xlu1 %v578_v54  ;;  %v1866_v36 = vsub.s32 %v725_v4, %v1580_v30 }
 0x138   :  { %564 = vadd.xlane.f32.xlu0 %v563_v19  ;;  %v679_v19 = vsub.s32 %v676_v6, %v1580_v30 }
 0x13a   :  { %612 = vadd.xlane.f32.xlu1 %v611_v56  ;;  %v746_v56 = vadd.s32 4294967192, %v1818_v49 }
 0x13c   :  { %567 = vadd.xlane.f32.xlu0 %v566_v18  ;;  %v1863_v18 = vsub.s32 %v718_v43, %v1580_v30  ;;  %v1881_v35 = vsub.s32 %v746_v56, %v1580_v30 }
 0x13e   :  { %615 = vadd.xlane.f32.xlu1 %v614_v28  ;;  %v1869_v28 = vsub.s32 %v732_v8, %v1580_v30 }
 0x140   :  { %570 = vadd.xlane.f32.xlu0 %v569_v13 }
 0x142   :  { %618 = vadd.xlane.f32.xlu1 %v617_v5 }
 0x144   :  { %573 = vadd.xlane.f32.xlu0 %v572_v22 }
 0x146   :  { %621 = vadd.xlane.f32.xlu1 %v620_v26 }
 0x195   :  { %v1785_v42 = vpop.xlane.xlu0 %528 }
 0x197   :  { %v1787_v37 = vpop.xlane.xlu1 %582 }
 0x198   :  { %v779_v22 = vrot.slane %v1787_v37, %v672_v20 }
 0x199   :  { %v1789_v38 = vpop.xlane.xlu0 %531 }
 0x19a   :  { %v666_v13 = vrot.slane %v1789_v38, %v665_v61  ;;  %v661_v38 = vrot.slane %v1785_v42, %v660_v57 }
 0x19b   :  { %v1791_v39 = vpop.xlane.xlu1 %588 }
 0x19c   :  { %v789_v37 = vrot.slane %v1791_v39, %v1841_v1  ;;  %v668_v42 = vsel %vm667_vm4, %v666_v13, %v661_v38 }
 0x19d   :  { %v1793_v41 = vpop.xlane.xlu0 %534 }
 0x19e   :  { %v673_v26 = vrot.slane %v1793_v41, %v672_v20 }
 0x19f   :  { %v1795_v47 = vpop.xlane.xlu1 %591 }
 0x1a1   :  { %v1797_v32 = vpop.xlane.xlu0 %537 }
 0x1a3   :  { %v1799_v44 = vpop.xlane.xlu1 %594 }
 0x1a4   :  { %v799_v62 = vrot.slane %v1799_v44, %v700_v29 }
 0x1a5   :  { %v1801_v17 = vpop.xlane.xlu0 %540 }
 0x1a6   :  { %v687_v41 = vrot.slane %v1801_v17, %v1841_v1  ;;  %v675_v17 = vsel %vm674_vm5, %v673_v26, %v668_v42 }
 0x1a7   :  { %v1803_v45 = vpop.xlane.xlu1 %597 }
 0x1a9   :  { %v1805_v46 = vpop.xlane.xlu0 %543 }
 0x1ab   :  { %v1807_v11 = vpop.xlane.xlu1 %600 }
 0x1ac   :  { %v809_v44 = vrot.slane %v1807_v11, %v1860_v24 }
 0x1ad   :  { %v1809_v53 = vpop.xlane.xlu0 %546 }
 0x1ae   :  { %v701_v21 = vrot.slane %v1809_v53, %v700_v29 }
 0x1af   :  { %v1811_v48 = vpop.xlane.xlu1 %603 }
 0x1b1   :  { %v1813_v14 = vpop.xlane.xlu0 %549 }
 0x1b3   :  { %v1815_v23 = vpop.xlane.xlu1 %606 }
 0x1b4   :  { %v819_v11 = vrot.slane %v1815_v23, %v1866_v36 }
 0x1b5   :  { %v1820_v50 = vpop.xlane.xlu0 %552 }
 0x1b6   :  { %v715_v53 = vrot.slane %v1820_v50, %v1860_v24 }
 0x1b7   :  { %v1822_v51 = vpop.xlane.xlu1 %609 }
 0x1b9   :  { %v1825_v15 = vpop.xlane.xlu0 %555 }
 0x1bb   :  { %v577_v52 = vpop.xlane.xlu1 %576 }
 0x1bc   :  { %v770_v2 = vrot.slane %v577_v52, %v660_v57  ;;  %v680_v52 = vrot.slane %v1797_v32, %v679_v19  ;;  %v794_v32 = vrot.slane %v1795_v47, %v1847_v7  ;;  %v694_v57 = vrot.slane %v1805_v46, %v1847_v7 }
 0x1bd   :  { %v1835_v12 = vpop.xlane.xlu0 %558  ;;  %v804_v47 = vrot.slane %v1803_v45, %v1857_v34  ;;  %v708_v46 = vrot.slane %v1813_v14, %v1857_v34  ;;  %v814_v45 = vrot.slane %v1811_v48, %v1863_v18  ;;  %v722_v14 = vrot.slane %v1825_v15, %v1863_v18 }
 0x1be   :  { %v682_v4 = vsel %vm681_vm6, %v680_v52, %v675_v17  ;;  %v729_v50 = vrot.slane %v1835_v12, %v1866_v36  ;;  %v824_v48 = vrot.slane %v1822_v51, %v1869_v28 }
 0x1bf   :  { %v586_v54 = vpop.xlane.xlu1 %585 }
 0x1c0   :  { %v784_v60 = vrot.slane %v586_v54, %v679_v19  ;;  %v689_v54 = vsel %vm688_vm7, %v687_v41, %v682_v4 }
 0x1c1   :  { %v1852_v25 = vpop.xlane.xlu0 %561  ;;  %v696_v19 = vsel %vm695_vm8, %v694_v57, %v689_v54 }
 0x1c2   :  { %v703_v56 = vsel %vm702_vm9, %v701_v21, %v696_v19  ;;  %v736_v15 = vrot.slane %v1852_v25, %v1869_v28 }
 0x1c3   :  { %v580_v33 = vpop.xlane.xlu1 %579  ;;  %v710_v24 = vsel %vm709_vm10, %v708_v46, %v703_v56 }
 0x1c4   :  { %v774_v5 = vrot.slane %v580_v33, %v665_v61  ;;  %v1895_v61 = vsub.s32 %v760_v10, %v1580_v30  ;;  %v717_v33 = vsel %vm716_vm11, %v715_v53, %v710_v24 }
 0x1c5   :  { %v1878_v9 = vpop.xlane.xlu0 %564  ;;  %v724_v13 = vsel %vm723_vm12, %v722_v14, %v717_v33 }
 0x1c6   :  { %v775_v6 = vsel %vm667_vm4, %v774_v5, %v770_v2  ;;  %v743_v23 = vrot.slane %v1878_v9, %v1874_v55  ;;  %v731_v28 = vsel %vm730_vm13, %v729_v50, %v724_v13  ;;  %vm846_vm4 = vcmask 1041409  }
 0x1c7   :  { %v780_v20 = vsel %vm674_vm5, %v779_v22, %v775_v6  ;;  %v613_v3 = vpop.xlane.xlu1 %612  ;;  %vm625_vm5 = vcmp.lt.s32.totalorder %v1818_v49, 16  ;;  %v932_v49 = vsub.s32 1, %v1580_v30 }
 0x1c8   :  { %v785_v39 = vsel %vm681_vm6, %v784_v60, %v780_v20  ;;  %v829_v36 = vrot.slane %v613_v3, %v1874_v55  ;;  %v738_v55 = vsel %vm737_vm14, %v736_v15, %v731_v28  ;;  %vm850_vm6 = vcmask 1041408  }
 0x1c9   :  { %v790_v1 = vsel %vm688_vm7, %v789_v37, %v785_v39  ;;  %v568_v43 = vpop.xlane.xlu0 %567  ;;  %v745_v60 = vsel %vm744_vm15, %v743_v23, %v738_v55 }
 0x1ca   :  { %v795_v8 = vsel %vm695_vm8, %v794_v32, %v790_v1  ;;  %v750_v51 = vrot.slane %v568_v43, %v1881_v35 }
 0x1cb   :  { %v800_v7 = vsel %vm702_vm9, %v799_v62, %v795_v8  ;;  %v616_v16 = vpop.xlane.xlu1 %615 }
 0x1cc   :  { %v805_v29 = vsel %vm709_vm10, %v804_v47, %v800_v7  ;;  %v834_v25 = vrot.slane %v616_v16, %v1881_v35  ;;  %v752_v35 = vsel %vm751_vm1, %v750_v51, %v745_v60 }
 0x1cd   :  { %v810_v31 = vsel %vm716_vm11, %v809_v44, %v805_v29  ;;  %v571_v34 = vpop.xlane.xlu0 %570 }
 0x1ce   :  { %v815_v18 = vsel %vm723_vm12, %v814_v45, %v810_v31  ;;  %v757_v22 = vrot.slane %v571_v34, %v1884_v27 }
 0x1cf   :  { %v820_v12 = vsel %vm730_vm13, %v819_v11, %v815_v18  ;;  %v619_v10 = vpop.xlane.xlu1 %618 }
 0x1d0   :  { %v825_v2 = vsel %vm737_vm14, %v824_v48, %v820_v12  ;;  %v839_v26 = vrot.slane %v619_v10, %v1884_v27  ;;  %v759_v41 = vsel %vm758_vm2, %v757_v22, %v752_v35 }
 0x1d1   :  { %v830_v5 = vsel %vm744_vm15, %v829_v36, %v825_v2  ;;  %v574_v9 = vpop.xlane.xlu0 %573 }
 0x1d2   :  { %v835_v38 = vsel %vm751_vm1, %v834_v25, %v830_v5  ;;  %v764_v52 = vrot.slane %v574_v9, %v1895_v61 }
 0x1d3   :  { %v622_v6 = vpop.xlane.xlu1 %621  ;;  %v840_v20 = vsel %vm758_vm2, %v839_v26, %v835_v38 }
 0x1d4   :  { %v844_v37 = vrot.slane %v622_v6, %v1895_v61  ;;  %v766_v27 = vsel %vm765_vm3, %v764_v52, %v759_v41 }
 0x1d6   :  { %v845_v3 = vsel %vm765_vm3, %v844_v37, %v840_v20 }
 0x1d7   :  { %v847_v42 = vsel %vm846_vm4, %v845_v3, %v766_v27 }
 0x1d8   :  { %v849_v32 = vsel %vm625_vm5, %v847_v42, -1e+30 }
 0x1d9   :  { %v851_v57 = vsel %vm850_vm6, %v849_v32, -inf }
 0x1da   :  { %852 = vmax.xlane.f32.xlu0 %v851_v57 }
 0x267   :  { %v853_v39 = vpop.xlane.xlu0 %852 }
 0x268   :  { %v854_v17 = vsub.f32 %v849_v32, %v853_v39 }
 0x26a   :  { %v855_v62 = vmul.f32 1.442695, %v854_v17 }
 0x26c   :  { %1253 = vpow2.f32 %v855_v62 }
 0x276   :  { %v1254_v21 = vpop.eup %1253 }
 0x277   :  { %v857_v1 = vsel %vm850_vm6, %v1254_v21, 0.0 }
 0x278   :  { %858 = vadd.xlane.f32.xlu1 %v857_v1 }
 0x305   :  { %v859_v61 = vpop.xlane.xlu1 %858 }
 0x306   :  { %1255 = vrcp.f32 %v859_v61 }
 0x310   :  { %v1256_v43 = vpop.eup %1255 }
 0x311   :  { %v862_v4 = vmul.f32 %v1256_v43, %v1254_v21 }
 0x313   :  { %v866_v47 = vrot.slane %v862_v4, %v1589_v40  ;;  %1109 = vst [vmem:[#allocation4] sm:$0x3] %v862_v4  ;;  %v933_v46 = vrot.slane %v862_v4, %v932_v49 }
 0x315   :  { %872 = vbcast.lane.b32.xlu1 %v866_v47, 264  ;;  %868 = vbcast.lane.b32.xlu0 %v866_v47, 256 }
 0x319   :  { %935 = vbcast.lane.b32.xlu1 %v933_v46, 256  ;;  %876 = vbcast.lane.b32.xlu0 %v866_v47, 272 }
 0x31d   :  { %939 = vbcast.lane.b32.xlu1 %v933_v46, 264  ;;  %880 = vbcast.lane.b32.xlu0 %v866_v47, 280 }
 0x321   :  { %943 = vbcast.lane.b32.xlu1 %v933_v46, 272  ;;  %884 = vbcast.lane.b32.xlu0 %v866_v47, 288 }
 0x325   :  { %947 = vbcast.lane.b32.xlu1 %v933_v46, 280  ;;  %888 = vbcast.lane.b32.xlu0 %v866_v47, 296 }
 0x329   :  { %951 = vbcast.lane.b32.xlu1 %v933_v46, 288  ;;  %892 = vbcast.lane.b32.xlu0 %v866_v47, 304 }
 0x32d   :  { %955 = vbcast.lane.b32.xlu1 %v933_v46, 296  ;;  %896 = vbcast.lane.b32.xlu0 %v866_v47, 312 }
 0x331   :  { %959 = vbcast.lane.b32.xlu1 %v933_v46, 304  ;;  %900 = vbcast.lane.b32.xlu0 %v866_v47, 320 }
 0x335   :  { %963 = vbcast.lane.b32.xlu1 %v933_v46, 312  ;;  %904 = vbcast.lane.b32.xlu0 %v866_v47, 328 }
 0x339   :  { %967 = vbcast.lane.b32.xlu1 %v933_v46, 320  ;;  %908 = vbcast.lane.b32.xlu0 %v866_v47, 336 }
 0x33d   :  { %971 = vbcast.lane.b32.xlu1 %v933_v46, 328  ;;  %912 = vbcast.lane.b32.xlu0 %v866_v47, 344 }
 0x341   :  { %975 = vbcast.lane.b32.xlu1 %v933_v46, 336  ;;  %916 = vbcast.lane.b32.xlu0 %v866_v47, 352 }
 0x345   :  { %979 = vbcast.lane.b32.xlu1 %v933_v46, 344  ;;  %920 = vbcast.lane.b32.xlu0 %v866_v47, 360 }
 0x349   :  { %983 = vbcast.lane.b32.xlu1 %v933_v46, 352  ;;  %924 = vbcast.lane.b32.xlu0 %v866_v47, 368 }
 0x34d   :  { %987 = vbcast.lane.b32.xlu1 %v933_v46, 360  ;;  %928 = vbcast.lane.b32.xlu0 %v866_v47, 376 }
 0x351   :  { %991 = vbcast.lane.b32.xlu1 %v933_v46, 368 }
 0x355   :  { %995 = vbcast.lane.b32.xlu1 %v933_v46, 376 }
 0x356   :  { %1296 = shalt.err (!%p1293_p4)
}
 0x357   :  { %s1297_s26 = scalar_lea.hbm %s2113_s8, 32 }
 0x358   :  { %p1298_p5 = scmp.ne.s32.totalorder %s2113_s8, %s1297_s26  ;;  %p1301_p6 = scmp.lt.u32.totalorder %s1297_s26, %s2113_s8 }
 0x35a   :  { %p1303_p7 = pnand %p1301_p6, %p1298_p5 }
 0x35c   :  { %1306 = shalt.err (!%p1303_p7)
}
 0x35d   :  { %1129 = dma.vmem_to_hbm [thread:$0]  %s1127_s22, 32, %s2113_s8, [#allocation5]   ;;  %v1257_v50 = vld [vmem:[%s2105_s0 + $0x8] sm:$0xff]  ;;  %v1258_v34 = vld [vmem:[%s2105_s0] sm:$0xff]  ;;  %v1259_v48 = vld [vmem:[%s2105_s0 + $0x10] sm:$0xff]  ;;  %vm1107_vm7 = vcmask 254976  }
 0x35e   :  { %v1260_v36 = vld [vmem:[%s2105_s0 + $0x18] sm:$0xff]  ;;  %v1261_v2 = vld [vmem:[%s2105_s0 + $0x20] sm:$0xff]  ;;  %v1262_v9 = vld [vmem:[%s2105_s0 + $0x28] sm:$0xff]  ;;  %s1338_s9 = smov [#allocation2]  }
 0x35f   :  { %v1263_v35 = vld [vmem:[%s2105_s0 + $0x30] sm:$0xff]  ;;  %v1265_v17 = vld [vmem:[%s2105_s0 + $0xa0] sm:$0xff]  ;;  %v1267_v46 = vld [vmem:[%s2105_s0 + $0xa8] sm:$0xff]  ;;  %s1116_s10 = sshll.u32 %s1338_s9, 4  ;;  %s1117_s10 = int_to_ptr.vmem [resolvable:$true] %s1116_s10 }
 0x360   :  { %p1312_p9 = scmp.lt.s32.totalorder %s1117_s10, %s1117_s10 }
 0x387   :  { %v873_v30 = vpop.permute.xlu1 %872  ;;  %v869_v40 = vpop.permute.xlu0 %868 }
 0x388   :  { %v998_v31 = vmul.f32 %v1257_v50, %v873_v30  ;;  %v997_v24 = vmul.f32 %v1258_v34, %v869_v40 }
 0x38a   :  { %v1030_v23 = vsel %vm93_vm0, %v998_v31, 0.0  ;;  %v1029_v12 = vsel %vm93_vm0, %v997_v24, 0.0  ;;  %v1271_v24 = vld [vmem:[%s2105_s0 + $0xb8] sm:$0xff] }
 0x38b   :  { %v936_v8 = vpop.permute.xlu1 %935  ;;  %v877_v54 = vpop.permute.xlu0 %876  ;;  %v1031_v25 = vadd.f32 %v1030_v23, %v1029_v12 }
 0x38c   :  { %v999_v15 = vmul.f32 %v1259_v48, %v877_v54  ;;  %v1013_v38 = vmul.f32 %v936_v8, %v1514_v58  ;;  %v1264_v58 = vld [vmem:[%s2105_s0 + $0x38] sm:$0xff]  ;;  %v1268_v8 = vld [vmem:[%s2105_s0 + $0x48] sm:$0xff] }
 0x38e   :  { %v1032_v13 = vsel %vm93_vm0, %v999_v15, 0.0  ;;  %v1066_v32 = vsel %vm93_vm0, %v1013_v38, 0.0 }
 0x38f   :  { %v940_v44 = vpop.permute.xlu1 %939  ;;  %v881_v53 = vpop.permute.xlu0 %880  ;;  %v1033_v52 = vadd.f32 %v1032_v13, %v1031_v25 }
 0x390   :  { %v1000_v10 = vmul.f32 %v1260_v36, %v881_v53  ;;  %v1014_v22 = vmul.f32 %v940_v44, %v1519_v59 }
 0x392   :  { %v1034_v26 = vsel %vm93_vm0, %v1000_v10, 0.0  ;;  %v1067_v27 = vsel %vm93_vm0, %v1014_v22, 0.0  ;;  %v1273_v10 = vld [vmem:[%s2105_s0 + $0xc0] sm:$0xff] }
 0x393   :  { %v944_v7 = vpop.permute.xlu1 %943  ;;  %v885_v16 = vpop.permute.xlu0 %884  ;;  %v1035_v59 = vadd.f32 %v1034_v26, %v1033_v52  ;;  %v1068_v61 = vadd.f32 %v1067_v27, %v1066_v32 }
 0x394   :  { %v1001_v51 = vmul.f32 %v1261_v2, %v885_v16  ;;  %v1015_v60 = vmul.f32 %v944_v7, %v1531_v63  ;;  %v1269_v16 = vld [vmem:[%s2105_s0 + $0xb0] sm:$0xff] }
 0x396   :  { %v1036_v6 = vsel %vm93_vm0, %v1001_v51, 0.0  ;;  %v1069_v39 = vsel %vm93_vm0, %v1015_v60, 0.0  ;;  %v1274_v51 = vld [vmem:[%s2105_s0 + $0x60] sm:$0xff]  ;;  %v1276_v60 = vld [vmem:[%s2105_s0 + $0x68] sm:$0xff] }
 0x397   :  { %v948_v19 = vpop.permute.xlu1 %947  ;;  %v889_v45 = vpop.permute.xlu0 %888  ;;  %v1037_v57 = vadd.f32 %v1036_v6, %v1035_v59  ;;  %v1070_v44 = vadd.f32 %v1069_v39, %v1068_v61 }
 0x398   :  { %v1002_v55 = vmul.f32 %v1262_v9, %v889_v45  ;;  %v1016_v3 = vmul.f32 %v948_v19, %v1536_v0  ;;  %v1266_v0 = vld [vmem:[%s2105_s0 + $0x40] sm:$0xff] }
 0x39a   :  { %v1038_v42 = vsel %vm93_vm0, %v1002_v55, 0.0  ;;  %v1071_v47 = vsel %vm93_vm0, %v1016_v3, 0.0  ;;  %v1275_v55 = vld [vmem:[%s2105_s0 + $0xc8] sm:$0xff] }
 0x39b   :  { %v952_v14 = vpop.permute.xlu1 %951  ;;  %v893_v29 = vpop.permute.xlu0 %892  ;;  %v1039_v43 = vadd.f32 %v1038_v42, %v1037_v57  ;;  %v1278_v57 = vld [vmem:[%s2105_s0 + $0xd8] sm:$0xff] }
 0x39c   :  { %v1003_v37 = vmul.f32 %v1263_v35, %v893_v29  ;;  %v1017_v62 = vmul.f32 %v1265_v17, %v952_v14  ;;  %v1270_v14 = vld [vmem:[%s2105_s0 + $0x50] sm:$0xff] }
 0x39e   :  { %v1040_v21 = vsel %vm93_vm0, %v1003_v37, 0.0  ;;  %v1073_v7 = vsel %vm93_vm0, %v1017_v62, 0.0  ;;  %v1279_v62 = vld [vmem:[%s2105_s0 + $0x70] sm:$0xff] }
 0x39f   :  { %v956_v56 = vpop.permute.xlu1 %955  ;;  %v897_v11 = vpop.permute.xlu0 %896  ;;  %v1041_v53 = vadd.f32 %v1040_v21, %v1039_v43  ;;  %v1280_v43 = vld [vmem:[%s2105_s0 + $0xe0] sm:$0xff] }
 0x3a0   :  { %v1004_v63 = vmul.f32 %v1264_v58, %v897_v11  ;;  %v1018_v30 = vmul.f32 %v1267_v46, %v956_v56  ;;  %v1072_v56 = vadd.f32 %v1071_v47, %v1070_v44 }
 0x3a2   :  { %v1042_v40 = vsel %vm93_vm0, %v1004_v63, 0.0  ;;  %v1075_v34 = vsel %vm93_vm0, %v1018_v30, 0.0  ;;  %v1074_v23 = vadd.f32 %v1073_v7, %v1072_v56 }
 0x3a3   :  { %v960_v18 = vpop.permute.xlu1 %959  ;;  %v901_v33 = vpop.permute.xlu0 %900  ;;  %v1043_v11 = vadd.f32 %v1042_v40, %v1041_v53  ;;  %v1282_v53 = vld [vmem:[%s2105_s0 + $0x78] sm:$0xff] }
 0x3a4   :  { %v1005_v1 = vmul.f32 %v1266_v0, %v901_v33  ;;  %v1019_v19 = vmul.f32 %v1269_v16, %v960_v18  ;;  %v1272_v18 = vld [vmem:[%s2105_s0 + $0x58] sm:$0xff] }
 0x3a6   :  { %v1044_v45 = vsel %vm93_vm0, %v1005_v1, 0.0  ;;  %v1077_v36 = vsel %vm93_vm0, %v1019_v19, 0.0 }
 0x3a7   :  { %v964_v28 = vpop.permute.xlu1 %963  ;;  %v905_v5 = vpop.permute.xlu0 %904  ;;  %v1045_v12 = vadd.f32 %v1044_v45, %v1043_v11 }
 0x3a8   :  { %v1006_v54 = vmul.f32 %v1268_v8, %v905_v5  ;;  %v1020_v48 = vmul.f32 %v1271_v24, %v964_v28  ;;  %v1076_v28 = vadd.f32 %v1075_v34, %v1074_v23 }
 0x3aa   :  { %v1046_v15 = vsel %vm93_vm0, %v1006_v54, 0.0  ;;  %v1079_v9 = vsel %vm93_vm0, %v1020_v48, 0.0  ;;  %v1078_v35 = vadd.f32 %v1077_v36, %v1076_v28  ;;  %v1281_v54 = vld [vmem:[%s2105_s0 + $0xe8] sm:$0xff] }
 0x3ab   :  { %v968_v41 = vpop.permute.xlu1 %967  ;;  %v909_v20 = vpop.permute.xlu0 %908  ;;  %v1047_v5 = vadd.f32 %v1046_v15, %v1045_v12  ;;  %v1284_v12 = vld [vmem:[%s2105_s0 + $0xf8] sm:$0xff] }
 0x3ac   :  { %v1007_v29 = vmul.f32 %v1270_v14, %v909_v20  ;;  %v1021_v13 = vmul.f32 %v1273_v10, %v968_v41  ;;  %v1277_v41 = vld [vmem:[%s2105_s0 + $0xd0] sm:$0xff]  ;;  %v1080_v3 = vadd.f32 %v1079_v9, %v1078_v35 }
 0x3ae   :  { %v1048_v2 = vsel %vm93_vm0, %v1007_v29, 0.0  ;;  %v1081_v59 = vsel %vm93_vm0, %v1021_v13, 0.0 }
 0x3af   :  { %v972_v4 = vpop.permute.xlu1 %971  ;;  %v913_v49 = vpop.permute.xlu0 %912  ;;  %v1049_v37 = vadd.f32 %v1048_v2, %v1047_v5  ;;  %v1082_v0 = vadd.f32 %v1081_v59, %v1080_v3 }
 0x3b0   :  { %v1008_v33 = vmul.f32 %v1272_v18, %v913_v49  ;;  %v1022_v38 = vmul.f32 %v1275_v55, %v972_v4 }
 0x3b2   :  { %v1050_v52 = vsel %vm93_vm0, %v1008_v33, 0.0  ;;  %v1083_v32 = vsel %vm93_vm0, %v1022_v38, 0.0 }
 0x3b3   :  { %v976_v50 = vpop.permute.xlu1 %975  ;;  %v917_v31 = vpop.permute.xlu0 %916  ;;  %v1051_v42 = vadd.f32 %v1050_v52, %v1049_v37  ;;  %v1084_v47 = vadd.f32 %v1083_v32, %v1082_v0 }
 0x3b4   :  { %v1009_v25 = vmul.f32 %v1274_v51, %v917_v31  ;;  %v1023_v20 = vmul.f32 %v1277_v41, %v976_v50  ;;  %v1283_v31 = vld [vmem:[%s2105_s0 + $0xf0] sm:$0xff]  ;;  %s1307_s0 = scalar_lea.vmem %s1117_s10, 32 }
 0x3b5   :  { %p1308_p8 = scmp.ne.s32.totalorder %s1117_s10, %s1307_s0  ;;  %p1313_p10 = scmp.lt.s32.totalorder %s1307_s0, %s1307_s0 }
 0x3b6   :  { %v1052_v27 = vsel %vm93_vm0, %v1009_v25, 0.0  ;;  %v1085_v61 = vsel %vm93_vm0, %v1023_v20, 0.0 }
 0x3b7   :  { %v980_v22 = vpop.permute.xlu1 %979  ;;  %v921_v26 = vpop.permute.xlu0 %920  ;;  %v1053_v1 = vadd.f32 %v1052_v27, %v1051_v42  ;;  %v1086_v16 = vadd.f32 %v1085_v61, %v1084_v47  ;;  %p1314_p11 = por %p1313_p10, %p1312_p9 }
 0x3b8   :  { %v1010_v6 = vmul.f32 %v1276_v60, %v921_v26  ;;  %v1024_v39 = vmul.f32 %v1278_v57, %v980_v22 }
 0x3b9   :  { %p1315_p12 = pnand %p1314_p11, %p1308_p8 }
 0x3ba   :  { %v1054_v17 = vsel %vm93_vm0, %v1010_v6, 0.0  ;;  %v1087_v8 = vsel %vm93_vm0, %v1024_v39, 0.0 }
 0x3bb   :  { %v984_v58 = vpop.permute.xlu1 %983  ;;  %v925_v63 = vpop.permute.xlu0 %924  ;;  %v1055_v46 = vadd.f32 %v1054_v17, %v1053_v1  ;;  %v1088_v29 = vadd.f32 %v1087_v8, %v1086_v16 }
 0x3bc   :  { %v1011_v21 = vmul.f32 %v1279_v62, %v925_v63  ;;  %v1025_v4 = vmul.f32 %v1280_v43, %v984_v58 }
 0x3be   :  { %v1056_v49 = vsel %vm93_vm0, %v1011_v21, 0.0  ;;  %v1089_v45 = vsel %vm93_vm0, %v1025_v4, 0.0 }
 0x3bf   :  { %v988_v30 = vpop.permute.xlu1 %987  ;;  %v929_v40 = vpop.permute.xlu0 %928  ;;  %v1057_v19 = vadd.f32 %v1056_v49, %v1055_v46  ;;  %v1090_v24 = vadd.f32 %v1089_v45, %v1088_v29 }
 0x3c0   :  { %v1026_v44 = vmul.f32 %v1281_v54, %v988_v30  ;;  %v1012_v7 = vmul.f32 %v1282_v53, %v929_v40 }
 0x3c2   :  { %v1058_v14 = vsel %vm93_vm0, %v1012_v7, 0.0  ;;  %v1091_v50 = vsel %vm93_vm0, %v1026_v44, 0.0 }
 0x3c3   :  { %v1059_v56 = vadd.f32 %v1058_v14, %v1057_v19  ;;  %v992_v11 = vpop.permute.xlu1 %991  ;;  %v1092_v18 = vadd.f32 %v1091_v50, %v1090_v24 }
 0x3c4   :  { %v1027_v34 = vmul.f32 %v1283_v31, %v992_v11 }
 0x3c5   :  { %v1060_v48 = vrot.slane %v1059_v56, 4 }
 0x3c6   :  { %v1093_v15 = vsel %vm93_vm0, %v1027_v34, 0.0 }
 0x3c7   :  { %v1061_v33 = vadd.f32 %v1060_v48, %v1059_v56  ;;  %v996_v23 = vpop.permute.xlu1 %995  ;;  %v1094_v10 = vadd.f32 %v1093_v15, %v1092_v18 }
 0x3c8   :  { %v1028_v36 = vmul.f32 %v1284_v12, %v996_v23 }
 0x3c9   :  { %v1062_v2 = vrot.slane %v1061_v33, 2 }
 0x3ca   :  { %v1095_v13 = vsel %vm93_vm0, %v1028_v36, 0.0 }
 0x3cb   :  { %v1096_v51 = vadd.f32 %v1095_v13, %v1094_v10  ;;  %v1063_v28 = vadd.f32 %v1062_v2, %v1061_v33 }
 0x3cd   :  { %v1097_v25 = vrot.slane %v1096_v51, 4  ;;  %v1064_v9 = vrot.slane %v1063_v28, 1 }
 0x3cf   :  { %v1098_v5 = vadd.f32 %v1097_v25, %v1096_v51  ;;  %v1065_v38 = vadd.f32 %v1064_v9, %v1063_v28 }
 0x3d1   :  { %v1099_v22 = vrot.slane %v1098_v5, 2 }
 0x3d3   :  { %v1100_v26 = vadd.f32 %v1099_v22, %v1098_v5 }
 0x3d5   :  { %v1101_v55 = vrot.slane %v1100_v26, 1 }
 0x3d7   :  { %v1102_v52 = vadd.f32 %v1101_v55, %v1100_v26 }
 0x3d9   :  { %v1105_v60 = vsel %vm846_vm4, %v1102_v52, %v1065_v38 }
 0x3da   :  { %1108 = vst.msk [vmem:[#allocation2] sm:$0x3] %vm1107_vm7, %v1105_v60 }
 0x3db   :  { %1318 = shalt.err (!%p1315_p12)
}
 0x3dc   :  { %s1319_s8 = scalar_lea.hbm %s2112_s7, 32 }
 0x3dd   :  { %p1320_p13 = scmp.ne.s32.totalorder %s2112_s7, %s1319_s8  ;;  %p1323_p0 = scmp.lt.u32.totalorder %s1319_s8, %s2112_s7 }
 0x3df   :  { %p1325_p1 = pnand %p1323_p0, %p1320_p13 }
 0x3e1   :  { %1328 = shalt.err (!%p1325_p1)
}
 0x3e2   :  { %1119 = dma.vmem_to_hbm [thread:$0]  %s1117_s10, 32, %s2112_s7, [#allocation3]  }
 0x3e3   :  { %1329 = dma.done.wait [#allocation3], 32  }
 0x3e4   :  { %1330 = vsyncadd [#allocation3], 4294967264 }
 0x3e5   :  { %1331 = dma.done.wait [#allocation5], 32  }
 0x3e6   :  { %1332 = vsyncadd [#allocation5], 4294967264 }
 0x3e7   :  { %1136 = vsyncpa [#allocation3], 1 }
 0x3e8   :  { %1137 = vsyncpa [#allocation5], 1 }

</bundles_post_ra>
